<compile_context>
chip_gen: v5e
topology: v5e:2x2
jax: 0.10.0
libtpu: 0.0.40
codegen_flags: <defaults>
</compile_context>

<pallas_src>
import functools

import jax
import jax.numpy as jnp
from jax.experimental import pallas as pl
from jax.experimental.pallas import tpu as pltpu


# ---------------------------------------------------------------------------
# Kernel 1: dense layer  y = x @ w + b   (b is zeros when qkv_bias=False)
# ---------------------------------------------------------------------------
def _linear_kernel(x_ref, w_ref, b_ref, o_ref):
    acc = jnp.dot(x_ref[...], w_ref[...], preferred_element_type=jnp.float32)
    o_ref[...] = (acc + b_ref[...]).astype(o_ref.dtype)


def _linear(x2d, w, b2d):
    """x2d: (M, Cin), w: (Cin, Cout), b2d: (1, Cout) -> (M, Cout)."""
    M, Cin = x2d.shape
    Cout = w.shape[1]
    # One lane-dense (block_m, Cout) output slab per grid step; tile rows only
    # when M is large (keeps VMEM bounded at production sizes).
    block_m = 512 if (M > 512 and M % 512 == 0) else M
    grid = (M // block_m,)
    return pl.pallas_call(
        _linear_kernel,
        out_shape=jax.ShapeDtypeStruct((M, Cout), x2d.dtype),
        grid_spec=pltpu.PrefetchScalarGridSpec(
            num_scalar_prefetch=0,
            grid=grid,
            in_specs=[
                pl.BlockSpec((block_m, Cin), lambda i: (i, 0)),
                pl.BlockSpec((Cin, Cout), lambda i: (0, 0)),
                pl.BlockSpec((1, Cout), lambda i: (0, 0)),
            ],
            out_specs=pl.BlockSpec((block_m, Cout), lambda i: (i, 0)),
        ),
        compiler_params=pltpu.CompilerParams(
            dimension_semantics=("parallel",)),
    )(x2d, w, b2d)


# ---------------------------------------------------------------------------
# Kernel 2: multi-head attention for one batch element (all heads per step)
# ---------------------------------------------------------------------------
def _mha_kernel(q_ref, k_ref, v_ref, o_ref, *, scale):
    q = q_ref[0]                                   # (H, Nq, D)
    k = k_ref[0]                                   # (H, Nk, D)
    v = v_ref[0]                                   # (H, Nk, D)
    s = jnp.einsum("hqd,hkd->hqk", q, k,
                   preferred_element_type=jnp.float32) * scale
    m = jnp.max(s, axis=-1, keepdims=True)         # stable softmax
    e = jnp.exp(s - m)
    p = e / jnp.sum(e, axis=-1, keepdims=True)
    o = jnp.einsum("hqk,hkd->hqd", p.astype(v.dtype), v,
                   preferred_element_type=jnp.float32)
    o_ref[0] = o.astype(o_ref.dtype)


def _mha(qh, kh, vh, scale):
    B, H, Nq, D = qh.shape
    Nk = kh.shape[2]
    kern = functools.partial(_mha_kernel, scale=scale)
    return pl.pallas_call(
        kern,
        out_shape=jax.ShapeDtypeStruct((B, H, Nq, D), qh.dtype),
        grid_spec=pltpu.PrefetchScalarGridSpec(
            num_scalar_prefetch=0,
            grid=(B,),
            in_specs=[
                pl.BlockSpec((1, H, Nq, D), lambda b: (b, 0, 0, 0)),
                pl.BlockSpec((1, H, Nk, D), lambda b: (b, 0, 0, 0)),
                pl.BlockSpec((1, H, Nk, D), lambda b: (b, 0, 0, 0)),
            ],
            out_specs=pl.BlockSpec((1, H, Nq, D), lambda b: (b, 0, 0, 0)),
        ),
        compiler_params=pltpu.CompilerParams(
            dimension_semantics=("parallel",)),
    )(qh, kh, vh)


# ---------------------------------------------------------------------------
# Full CrossAttention forward
# ---------------------------------------------------------------------------
@functools.partial(jax.jit, static_argnames=("num_heads",))
def cross_attention(query, key, value, wq, wk, wv, wo, bo, *, num_heads):
    """query: (B,Nq,C), key/value: (B,Nk,C). Weights stored (in, out) = W.T."""
    B, Nq, C = query.shape
    Nk = key.shape[1]
    D = C // num_heads
    scale = D ** (-0.5)

    zero_b = jnp.zeros((1, C), query.dtype)        # qkv_bias=False
    q = _linear(query.reshape(B * Nq, C), wq, zero_b).reshape(B, Nq, C)
    k = _linear(key.reshape(B * Nk, C), wk, zero_b).reshape(B, Nk, C)
    v = _linear(value.reshape(B * Nk, C), wv, zero_b).reshape(B, Nk, C)

    # Head split: wrapper-side layout plumbing only (kept out of the kernels).
    qh = jnp.transpose(q.reshape(B, Nq, num_heads, D), (0, 2, 1, 3))
    kh = jnp.transpose(k.reshape(B, Nk, num_heads, D), (0, 2, 1, 3))
    vh = jnp.transpose(v.reshape(B, Nk, num_heads, D), (0, 2, 1, 3))

    ctx = _mha(qh, kh, vh, scale)                  # (B, H, Nq, D)
    ctx = jnp.transpose(ctx, (0, 2, 1, 3)).reshape(B * Nq, C)

    out = _linear(ctx, wo, bo.reshape(1, C))       # output projection (+bias)
    return out.reshape(B, Nq, C)


# ---------------------------------------------------------------------------
# Plain-JAX reference (matches the PyTorch forward)
# ---------------------------------------------------------------------------
def _reference(query, key, value, wq, wk, wv, wo, bo, num_heads):
    B, Nq, C = query.shape
    Nk = key.shape[1]
    D = C // num_heads
    scale = D ** (-0.5)
    q = jnp.transpose((query @ wq).reshape(B, Nq, num_heads, D), (0, 2, 1, 3))
    k = jnp.transpose((key @ wk).reshape(B, Nk, num_heads, D), (0, 2, 1, 3))
    v = jnp.transpose((value @ wv).reshape(B, Nk, num_heads, D), (0, 2, 1, 3))
    attn = jnp.einsum("bhqd,bhkd->bhqk", q, k) * scale
    attn = jax.nn.softmax(attn, axis=-1)
    x = jnp.einsum("bhqk,bhkd->bhqd", attn, v)
    x = jnp.transpose(x, (0, 2, 1, 3)).reshape(B, Nq, C)
    return x @ wo + bo


if __name__ == "__main__":
    B, Nq, Nk, C, H = 2, 16, 8, 32, 4   # dim=32, num_heads=4 -> head_dim=8

    key0 = jax.random.PRNGKey(0)
    ks = jax.random.split(key0, 8)
    query = jax.random.normal(ks[0], (B, Nq, C), jnp.float32)
    key_t = jax.random.normal(ks[1], (B, Nk, C), jnp.float32)
    value = jax.random.normal(ks[2], (B, Nk, C), jnp.float32)
    # Linear weights stored as (in, out)  (== PyTorch nn.Linear weight.T).
    wq = jax.random.normal(ks[3], (C, C), jnp.float32) * 0.1
    wk = jax.random.normal(ks[4], (C, C), jnp.float32) * 0.1
    wv = jax.random.normal(ks[5], (C, C), jnp.float32) * 0.1
    wo = jax.random.normal(ks[6], (C, C), jnp.float32) * 0.1
    bo = jax.random.normal(ks[7], (C,), jnp.float32) * 0.1

    out = cross_attention(query, key_t, value, wq, wk, wv, wo, bo, num_heads=H)
    out = jax.block_until_ready(out)

    ref = _reference(query, key_t, value, wq, wk, wv, wo, bo, H)
    assert out.shape == (B, Nq, C)
    assert jnp.allclose(out, ref, atol=1e-4, rtol=1e-4), "mismatch vs reference"

    print("KERNEL_OK")
</pallas_src>

<mosaic_0001>
module attributes {stable_mosaic.version = 11 : i64} {
  func.func @_linear_kernel(%arg0: i32, %arg1: memref<16x32xf32, #tpu.memory_space<vmem>>, %arg2: memref<32x32xf32, #tpu.memory_space<vmem>>, %arg3: memref<1x32xf32, #tpu.memory_space<vmem>>, %arg4: memref<16x32xf32, #tpu.memory_space<vmem>>) attributes {dimension_semantics = [#tpu.dimension_semantics<parallel>], iteration_bounds = array<i64: 1>, scalar_prefetch = 0 : i64, scratch_operands = 0 : i64, tpu.core_type = #tpu.core_type<tc>, window_params = [{transform_indices = @transform_0, window_bounds = array<i64: 16, 32>}, {pipeline_mode = #tpu.pipeline_mode<synchronous>, transform_indices = @transform_1, window_bounds = array<i64: 32, 32>}, {pipeline_mode = #tpu.pipeline_mode<synchronous>, transform_indices = @transform_2, window_bounds = array<i64: 1, 32>}, {transform_indices = @transform_3, window_bounds = array<i64: 16, 32>}]} {
    %c0 = arith.constant 0 : index
    %c0_0 = arith.constant 0 : index
    %0 = vector.load %arg1[%c0, %c0_0] : memref<16x32xf32, #tpu.memory_space<vmem>>, vector<16x32xf32>
    %c0_1 = arith.constant 0 : index
    %c0_2 = arith.constant 0 : index
    %1 = vector.load %arg2[%c0_1, %c0_2] : memref<32x32xf32, #tpu.memory_space<vmem>>, vector<32x32xf32>
    %cst = arith.constant dense<0.000000e+00> : vector<16x32xf32>
    %2 = tpu.matmul %0, %1, %cst {dimension_numbers = #tpu.dot_dimension_numbers<[1], [0], [0], [1], [0, 0, 1, 1], [], []>} : vector<16x32xf32>, vector<32x32xf32>, vector<16x32xf32> -> vector<16x32xf32>
    %c0_3 = arith.constant 0 : index
    %c0_4 = arith.constant 0 : index
    %3 = vector.load %arg3[%c0_3, %c0_4] : memref<1x32xf32, #tpu.memory_space<vmem>>, vector<1x32xf32>
    %4 = vector.broadcast %3 : vector<1x32xf32> to vector<16x32xf32>
    %5 = arith.addf %2, %4 : vector<16x32xf32>
    %c0_5 = arith.constant 0 : index
    %c0_6 = arith.constant 0 : index
    %6 = vector.load %arg4[%c0_5, %c0_6] : memref<16x32xf32, #tpu.memory_space<vmem>>, vector<16x32xf32>
    tpu.vector_store %arg4[%c0_5, %c0_6], %5 {strides = array<i32>} : memref<16x32xf32, #tpu.memory_space<vmem>>, vector<16x32xf32>,
    return
  }
  func.func @transform_0(%arg0: i32) -> (i32, i32) {
    %c0_i32 = arith.constant 0 : i32
    %c0_i32_0 = arith.constant 0 : i32
    return %arg0, %c0_i32 : i32, i32
  }
  func.func @transform_1(%arg0: i32) -> (i32, i32) {
    %c0_i32 = arith.constant 0 : i32
    %c0_i32_0 = arith.constant 0 : i32
    %c0_i32_1 = arith.constant 0 : i32
    return %c0_i32, %c0_i32_0 : i32, i32
  }
  func.func @transform_2(%arg0: i32) -> (i32, i32) {
    %c0_i32 = arith.constant 0 : i32
    %c0_i32_0 = arith.constant 0 : i32
    %c0_i32_1 = arith.constant 0 : i32
    return %c0_i32, %c0_i32_0 : i32, i32
  }
  func.func @transform_3(%arg0: i32) -> (i32, i32) {
    %c0_i32 = arith.constant 0 : i32
    %c0_i32_0 = arith.constant 0 : i32
    return %arg0, %c0_i32 : i32, i32
  }
}

module attributes {stable_mosaic.version = 11 : i64} {
  func.func @_linear_kernel(%arg0: i32, %arg1: memref<32x32xf32, #tpu.memory_space<vmem>>, %arg2: memref<32x32xf32, #tpu.memory_space<vmem>>, %arg3: memref<1x32xf32, #tpu.memory_space<vmem>>, %arg4: memref<32x32xf32, #tpu.memory_space<vmem>>) attributes {dimension_semantics = [#tpu.dimension_semantics<parallel>], iteration_bounds = array<i64: 1>, scalar_prefetch = 0 : i64, scratch_operands = 0 : i64, tpu.core_type = #tpu.core_type<tc>, window_params = [{transform_indices = @transform_0, window_bounds = array<i64: 32, 32>}, {pipeline_mode = #tpu.pipeline_mode<synchronous>, transform_indices = @transform_1, window_bounds = array<i64: 32, 32>}, {pipeline_mode = #tpu.pipeline_mode<synchronous>, transform_indices = @transform_2, window_bounds = array<i64: 1, 32>}, {transform_indices = @transform_3, window_bounds = array<i64: 32, 32>}]} {
    %c0 = arith.constant 0 : index
    %c0_0 = arith.constant 0 : index
    %0 = vector.load %arg1[%c0, %c0_0] : memref<32x32xf32, #tpu.memory_space<vmem>>, vector<32x32xf32>
    %c0_1 = arith.constant 0 : index
    %c0_2 = arith.constant 0 : index
    %1 = vector.load %arg2[%c0_1, %c0_2] : memref<32x32xf32, #tpu.memory_space<vmem>>, vector<32x32xf32>
    %cst = arith.constant dense<0.000000e+00> : vector<32x32xf32>
    %2 = tpu.matmul %0, %1, %cst {dimension_numbers = #tpu.dot_dimension_numbers<[1], [0], [0], [1], [0, 0, 1, 1], [], []>} : vector<32x32xf32>, vector<32x32xf32>, vector<32x32xf32> -> vector<32x32xf32>
    %c0_3 = arith.constant 0 : index
    %c0_4 = arith.constant 0 : index
    %3 = vector.load %arg3[%c0_3, %c0_4] : memref<1x32xf32, #tpu.memory_space<vmem>>, vector<1x32xf32>
    %4 = vector.broadcast %3 : vector<1x32xf32> to vector<32x32xf32>
    %5 = arith.addf %2, %4 : vector<32x32xf32>
    %c0_5 = arith.constant 0 : index
    %c0_6 = arith.constant 0 : index
    %6 = vector.load %arg4[%c0_5, %c0_6] : memref<32x32xf32, #tpu.memory_space<vmem>>, vector<32x32xf32>
    tpu.vector_store %arg4[%c0_5, %c0_6], %5 {strides = array<i32>} : memref<32x32xf32, #tpu.memory_space<vmem>>, vector<32x32xf32>,
    return
  }
  func.func @transform_0(%arg0: i32) -> (i32, i32) {
    %c0_i32 = arith.constant 0 : i32
    %c0_i32_0 = arith.constant 0 : i32
    return %arg0, %c0_i32 : i32, i32
  }
  func.func @transform_1(%arg0: i32) -> (i32, i32) {
    %c0_i32 = arith.constant 0 : i32
    %c0_i32_0 = arith.constant 0 : i32
    %c0_i32_1 = arith.constant 0 : i32
    return %c0_i32, %c0_i32_0 : i32, i32
  }
  func.func @transform_2(%arg0: i32) -> (i32, i32) {
    %c0_i32 = arith.constant 0 : i32
    %c0_i32_0 = arith.constant 0 : i32
    %c0_i32_1 = arith.constant 0 : i32
    return %c0_i32, %c0_i32_0 : i32, i32
  }
  func.func @transform_3(%arg0: i32) -> (i32, i32) {
    %c0_i32 = arith.constant 0 : i32
    %c0_i32_0 = arith.constant 0 : i32
    return %arg0, %c0_i32 : i32, i32
  }
}

module attributes {stable_mosaic.version = 11 : i64} {
  func.func @_mha_kernel(%arg0: i32, %arg1: memref<1x4x16x8xf32, #tpu.memory_space<vmem>>, %arg2: memref<1x4x8x8xf32, #tpu.memory_space<vmem>>, %arg3: memref<1x4x8x8xf32, #tpu.memory_space<vmem>>, %arg4: memref<1x4x16x8xf32, #tpu.memory_space<vmem>>) attributes {dimension_semantics = [#tpu.dimension_semantics<parallel>], iteration_bounds = array<i64: 2>, scalar_prefetch = 0 : i64, scratch_operands = 0 : i64, tpu.core_type = #tpu.core_type<tc>, window_params = [{transform_indices = @transform_0, window_bounds = array<i64: 1, 4, 16, 8>}, {transform_indices = @transform_1, window_bounds = array<i64: 1, 4, 8, 8>}, {transform_indices = @transform_2, window_bounds = array<i64: 1, 4, 8, 8>}, {transform_indices = @transform_3, window_bounds = array<i64: 1, 4, 16, 8>}]} {
    %c0 = arith.constant 0 : index
    %c0_0 = arith.constant 0 : index
    %c0_1 = arith.constant 0 : index
    %c0_2 = arith.constant 0 : index
    %0 = vector.load %arg1[%c0, %c0_0, %c0_1, %c0_2] : memref<1x4x16x8xf32, #tpu.memory_space<vmem>>, vector<1x4x16x8xf32>
    %1 = vector.shape_cast %0 : vector<1x4x16x8xf32> to vector<4x16x8xf32>
    %c0_3 = arith.constant 0 : index
    %c0_4 = arith.constant 0 : index
    %c0_5 = arith.constant 0 : index
    %c0_6 = arith.constant 0 : index
    %2 = vector.load %arg2[%c0_3, %c0_4, %c0_5, %c0_6] : memref<1x4x8x8xf32, #tpu.memory_space<vmem>>, vector<1x4x8x8xf32>
    %3 = vector.shape_cast %2 : vector<1x4x8x8xf32> to vector<4x8x8xf32>
    %c0_7 = arith.constant 0 : index
    %c0_8 = arith.constant 0 : index
    %c0_9 = arith.constant 0 : index
    %c0_10 = arith.constant 0 : index
    %4 = vector.load %arg3[%c0_7, %c0_8, %c0_9, %c0_10] : memref<1x4x8x8xf32, #tpu.memory_space<vmem>>, vector<1x4x8x8xf32>
    %5 = vector.shape_cast %4 : vector<1x4x8x8xf32> to vector<4x8x8xf32>
    "tpu.trace_start"() <{level = 10 : i32, message = "hqd,hkd->hqk"}> : () -> ()
    %cst = arith.constant dense<0.000000e+00> : vector<4x16x8xf32>
    %6 = tpu.matmul %1, %3, %cst {dimension_numbers = #tpu.dot_dimension_numbers<[2], [2], [1], [1], [0, 0, 0, 1, 1, 1], [0], [0]>} : vector<4x16x8xf32>, vector<4x8x8xf32>, vector<4x16x8xf32> -> vector<4x16x8xf32>
    "tpu.trace_stop"() : () -> ()
    %cst_11 = arith.constant 0.353553385 : f32
    %7 = vector.broadcast %cst_11 : f32 to vector<4x16x8xf32>
    %8 = arith.mulf %6, %7 : vector<4x16x8xf32>
    %cst_12 = arith.constant dense<0xFF800000> : vector<4x16xf32>
    %9 = vector.multi_reduction <maximumf>, %8, %cst_12 [2] : vector<4x16x8xf32> to vector<4x16xf32>
    %10 = vector.shape_cast %9 : vector<4x16xf32> to vector<4x16x1xf32>
    %11 = vector.broadcast %10 : vector<4x16x1xf32> to vector<4x16x8xf32>
    %12 = arith.subf %8, %11 : vector<4x16x8xf32>
    %13 = math.exp %12 : vector<4x16x8xf32>
    %cst_13 = arith.constant dense<0.000000e+00> : vector<4x16xf32>
    %14 = vector.multi_reduction <add>, %13, %cst_13 [2] : vector<4x16x8xf32> to vector<4x16xf32>
    %15 = vector.shape_cast %14 : vector<4x16xf32> to vector<4x16x1xf32>
    %16 = vector.broadcast %15 : vector<4x16x1xf32> to vector<4x16x8xf32>
    %17 = arith.divf %13, %16 : vector<4x16x8xf32>
    "tpu.trace_start"() <{level = 10 : i32, message = "hqk,hkd->hqd"}> : () -> ()
    %cst_14 = arith.constant dense<0.000000e+00> : vector<4x16x8xf32>
    %18 = tpu.matmul %17, %5, %cst_14 {dimension_numbers = #tpu.dot_dimension_numbers<[2], [1], [1], [2], [0, 0, 0, 1, 1, 2], [0], [0]>} : vector<4x16x8xf32>, vector<4x8x8xf32>, vector<4x16x8xf32> -> vector<4x16x8xf32>
    "tpu.trace_stop"() : () -> ()
    %c0_15 = arith.constant 0 : index
    %c0_16 = arith.constant 0 : index
    %c0_17 = arith.constant 0 : index
    %c0_18 = arith.constant 0 : index
    %19 = vector.load %arg4[%c0_15, %c0_16, %c0_17, %c0_18] : memref<1x4x16x8xf32, #tpu.memory_space<vmem>>, vector<1x4x16x8xf32>
    %20 = vector.shape_cast %19 : vector<1x4x16x8xf32> to vector<4x16x8xf32>
    %21 = vector.shape_cast %18 : vector<4x16x8xf32> to vector<1x4x16x8xf32>
    tpu.vector_store %arg4[%c0_15, %c0_16, %c0_17, %c0_18], %21 {strides = array<i32>} : memref<1x4x16x8xf32, #tpu.memory_space<vmem>>, vector<1x4x16x8xf32>,
    return
  }
  func.func @transform_0(%arg0: i32) -> (i32, i32, i32, i32) {
    %c0_i32 = arith.constant 0 : i32
    %c0_i32_0 = arith.constant 0 : i32
    %c0_i32_1 = arith.constant 0 : i32
    %c0_i32_2 = arith.constant 0 : i32
    return %arg0, %c0_i32, %c0_i32_0, %c0_i32_1 : i32, i32, i32, i32
  }
  func.func @transform_1(%arg0: i32) -> (i32, i32, i32, i32) {
    %c0_i32 = arith.constant 0 : i32
    %c0_i32_0 = arith.constant 0 : i32
    %c0_i32_1 = arith.constant 0 : i32
    %c0_i32_2 = arith.constant 0 : i32
    return %arg0, %c0_i32, %c0_i32_0, %c0_i32_1 : i32, i32, i32, i32
  }
  func.func @transform_2(%arg0: i32) -> (i32, i32, i32, i32) {
    %c0_i32 = arith.constant 0 : i32
    %c0_i32_0 = arith.constant 0 : i32
    %c0_i32_1 = arith.constant 0 : i32
    %c0_i32_2 = arith.constant 0 : i32
    return %arg0, %c0_i32, %c0_i32_0, %c0_i32_1 : i32, i32, i32, i32
  }
  func.func @transform_3(%arg0: i32) -> (i32, i32, i32, i32) {
    %c0_i32 = arith.constant 0 : i32
    %c0_i32_0 = arith.constant 0 : i32
    %c0_i32_1 = arith.constant 0 : i32
    %c0_i32_2 = arith.constant 0 : i32
    return %arg0, %c0_i32, %c0_i32_0, %c0_i32_1 : i32, i32, i32, i32
  }
}

module attributes {stable_mosaic.version = 11 : i64} {
  func.func @_linear_kernel(%arg0: i32, %arg1: memref<32x32xf32, #tpu.memory_space<vmem>>, %arg2: memref<32x32xf32, #tpu.memory_space<vmem>>, %arg3: memref<1x32xf32, #tpu.memory_space<vmem>>, %arg4: memref<32x32xf32, #tpu.memory_space<vmem>>) attributes {dimension_semantics = [#tpu.dimension_semantics<parallel>], iteration_bounds = array<i64: 1>, scalar_prefetch = 0 : i64, scratch_operands = 0 : i64, tpu.core_type = #tpu.core_type<tc>, window_params = [{transform_indices = @transform_0, window_bounds = array<i64: 32, 32>}, {pipeline_mode = #tpu.pipeline_mode<synchronous>, transform_indices = @transform_1, window_bounds = array<i64: 32, 32>}, {pipeline_mode = #tpu.pipeline_mode<synchronous>, transform_indices = @transform_2, window_bounds = array<i64: 1, 32>}, {transform_indices = @transform_3, window_bounds = array<i64: 32, 32>}]} {
    %c0 = arith.constant 0 : index
    %c0_0 = arith.constant 0 : index
    %0 = vector.load %arg1[%c0, %c0_0] : memref<32x32xf32, #tpu.memory_space<vmem>>, vector<32x32xf32>
    %c0_1 = arith.constant 0 : index
    %c0_2 = arith.constant 0 : index
    %1 = vector.load %arg2[%c0_1, %c0_2] : memref<32x32xf32, #tpu.memory_space<vmem>>, vector<32x32xf32>
    %cst = arith.constant dense<0.000000e+00> : vector<32x32xf32>
    %2 = tpu.matmul %0, %1, %cst {dimension_numbers = #tpu.dot_dimension_numbers<[1], [0], [0], [1], [0, 0, 1, 1], [], []>} : vector<32x32xf32>, vector<32x32xf32>, vector<32x32xf32> -> vector<32x32xf32>
    %c0_3 = arith.constant 0 : index
    %c0_4 = arith.constant 0 : index
    %3 = vector.load %arg3[%c0_3, %c0_4] : memref<1x32xf32, #tpu.memory_space<vmem>>, vector<1x32xf32>
    %4 = vector.broadcast %3 : vector<1x32xf32> to vector<32x32xf32>
    %5 = arith.addf %2, %4 : vector<32x32xf32>
    %c0_5 = arith.constant 0 : index
    %c0_6 = arith.constant 0 : index
    %6 = vector.load %arg4[%c0_5, %c0_6] : memref<32x32xf32, #tpu.memory_space<vmem>>, vector<32x32xf32>
    tpu.vector_store %arg4[%c0_5, %c0_6], %5 {strides = array<i32>} : memref<32x32xf32, #tpu.memory_space<vmem>>, vector<32x32xf32>,
    return
  }
  func.func @transform_0(%arg0: i32) -> (i32, i32) {
    %c0_i32 = arith.constant 0 : i32
    %c0_i32_0 = arith.constant 0 : i32
    return %arg0, %c0_i32 : i32, i32
  }
  func.func @transform_1(%arg0: i32) -> (i32, i32) {
    %c0_i32 = arith.constant 0 : i32
    %c0_i32_0 = arith.constant 0 : i32
    %c0_i32_1 = arith.constant 0 : i32
    return %c0_i32, %c0_i32_0 : i32, i32
  }
  func.func @transform_2(%arg0: i32) -> (i32, i32) {
    %c0_i32 = arith.constant 0 : i32
    %c0_i32_0 = arith.constant 0 : i32
    %c0_i32_1 = arith.constant 0 : i32
    return %c0_i32, %c0_i32_0 : i32, i32
  }
  func.func @transform_3(%arg0: i32) -> (i32, i32) {
    %c0_i32 = arith.constant 0 : i32
    %c0_i32_0 = arith.constant 0 : i32
    return %arg0, %c0_i32 : i32, i32
  }
}

</mosaic_0001>

<bundles_post_ra>
// kernel: cross_attention.7
= control target key start
LH: loop header
LB: loop body
LE: loop exit
PB: predicated region body
PF: predicated region fallthrough
CT: control target
= control target key end

     0   :  { %8 = vsyncpa [#allocation3], 0  ;;  %s196_s0 = inlined_call_operand.hbm [shape: f32[16,32], index: 0, kind: input, shape index: {}]   ;;  %s197_s1 = inlined_call_operand.hbm [shape: f32[32,32], index: 1, kind: input, shape index: {}]   ;;  %s198_s2 = inlined_call_operand.vmem [shape: f32[1,32], index: 2, kind: input, shape index: {}]   ;;  %s199_s3 = inlined_call_operand.vmem [shape: f32[16,32], index: 3, kind: output, shape index: {}]  }
   0x1   :  { %s14_s14 = sshll.u32 %s196_s0, 4  ;;  %s15_s14 = int_to_ptr.hbm [resolvable:$true] %s14_s14 }
   0x2   :  { %9 = vsyncpa [#allocation5], 0  ;;  %s157_s15 = smov [#allocation2]   ;;  %s27_s19 = sshll.u32 %s197_s1, 4  ;;  %s28_s19 = int_to_ptr.hbm [resolvable:$true] %s27_s19 }
   0x3   :  { %s16_s16 = sshll.u32 %s157_s15, 4  ;;  %s158_s20 = smov 128   ;;  %s17_s16 = int_to_ptr.vmem [resolvable:$true] %s16_s16 }
   0x4   :  { %s159_s21 = smov 8   ;;  %s160_s22 = smov [#allocation4]  }
   0x5   :  { %22 = dma.hbm_to_vmem [thread:$0]  %s15_s14, 256, %s17_s16, [#allocation3], %s158_s20, %s158_s20, %s159_s21  }
   0x6   :  { %s29_s23 = sshll.u32 %s160_s22, 4  ;;  %s30_s23 = int_to_ptr.vmem [resolvable:$true] %s29_s23 }
   0x7   :  { %35 = dma.hbm_to_vmem [thread:$0]  %s28_s19, 512, %s30_s23, [#allocation5], %s158_s20, %s158_s20, %s159_s21  }
   0x8   :  { %153 = dma.done.wait [#allocation3], 256  }
   0x9   :  { %154 = vsyncadd [#allocation3], 4294967040 }
   0xa   :  { %155 = dma.done.wait [#allocation5], 512  }
   0xb   :  { %156 = vsyncadd [#allocation5], 4294966784  ;;  %v51_v0 = vld [vmem:[#allocation4 + $0x18] sm:$0xff]  ;;  %v50_v1 = vld [vmem:[#allocation4 + $0x10] sm:$0xff]  ;;  %vm56_vm0 = vcmask 261120  }
   0xc   :  { %75 = vmatpush.msra.mxu0 %v51_v0  ;;  %96 = vmatpush.msra.mxu1 %v51_v0  ;;  %v49_v2 = vld [vmem:[#allocation4 + $0x8] sm:$0xff]  ;;  %v48_v3 = vld [vmem:[#allocation4] sm:$0xff]  ;;  %v46_v4 = vld [vmem:[#allocation2] sm:$0xff] }
   0xd   :  { %v47_v5 = vld [vmem:[#allocation2 + $0x8] sm:$0xff]  ;;  %v104_v6 = vld [vmem:[%s198_s2] ss:$0 sm:$0xff] }
   0xe   :  { %76 = vmatpush.msra.mxu0 %v50_v1  ;;  %97 = vmatpush.msra.mxu1 %v50_v1 }
  0x10   :  { %77 = vmatpush.msra.mxu0 %v49_v2  ;;  %98 = vmatpush.msra.mxu1 %v49_v2 }
  0x12   :  { %78 = vmatpush.msra.mxu0 %v48_v3  ;;  %99 = vmatpush.msra.mxu1 %v48_v3 }
  0x13   :  { %94 = vmatmul.msk.f32.vlgmr.msra.gmra.mxu0 %vm56_vm0, %v46_v4  ;;  %95 = vmatmul.msk.f32.vlgmr.msra.gmra.mxu1 %vm56_vm0, %v47_v5 }
  0x90   :  { %v80_v7 = vpop.f32.mrf.mxu0  ;;  %v83_v8 = vpop.f32.mrf.mxu1 }
  0x91   :  { %v81_v9 = vadd.f32 %v104_v6, %v80_v7  ;;  %v84_v10 = vadd.f32 %v104_v6, %v83_v8 }
  0x93   :  { %86 = vst.msk [vmem:[%s199_s3] sm:$0xff] %vm56_vm0, %v81_v9 }
  0x94   :  { %87 = vst.msk [vmem:[%s199_s3 + $0x8] sm:$0xff] %vm56_vm0, %v84_v10 }
  0x95   :  { %92 = vsyncpa [#allocation3], 1 }
  0x96   :  { %93 = vsyncpa [#allocation5], 1 }

// kernel: cross_attention.5
= control target key start
LH: loop header
LB: loop body
LE: loop exit
PB: predicated region body
PF: predicated region fallthrough
CT: control target
= control target key end

     0   :  { %8 = vsyncpa [#allocation3], 0  ;;  %s236_s0 = inlined_call_operand.hbm [shape: f32[32,32], index: 0, kind: input, shape index: {}]   ;;  %s237_s1 = inlined_call_operand.hbm [shape: f32[32,32], index: 1, kind: input, shape index: {}]   ;;  %s238_s2 = inlined_call_operand.vmem [shape: f32[1,32], index: 2, kind: input, shape index: {}]   ;;  %s239_s3 = inlined_call_operand.vmem [shape: f32[32,32], index: 3, kind: output, shape index: {}]  }
   0x1   :  { %s14_s14 = sshll.u32 %s236_s0, 4  ;;  %s15_s14 = int_to_ptr.hbm [resolvable:$true] %s14_s14 }
   0x2   :  { %9 = vsyncpa [#allocation5], 0  ;;  %s183_s15 = smov [#allocation2]   ;;  %s27_s19 = sshll.u32 %s237_s1, 4  ;;  %s28_s19 = int_to_ptr.hbm [resolvable:$true] %s27_s19 }
   0x3   :  { %s16_s16 = sshll.u32 %s183_s15, 4  ;;  %s184_s20 = smov 128   ;;  %s17_s16 = int_to_ptr.vmem [resolvable:$true] %s16_s16 }
   0x4   :  { %s185_s21 = smov 8   ;;  %s186_s22 = smov [#allocation4]  }
   0x5   :  { %22 = dma.hbm_to_vmem [thread:$0]  %s15_s14, 512, %s17_s16, [#allocation3], %s184_s20, %s184_s20, %s185_s21  }
   0x6   :  { %s29_s23 = sshll.u32 %s186_s22, 4  ;;  %s30_s23 = int_to_ptr.vmem [resolvable:$true] %s29_s23 }
   0x7   :  { %35 = dma.hbm_to_vmem [thread:$0]  %s28_s19, 512, %s30_s23, [#allocation5], %s184_s20, %s184_s20, %s185_s21  }
   0x8   :  { %179 = dma.done.wait [#allocation3], 512  }
   0x9   :  { %180 = vsyncadd [#allocation3], 4294966784 }
   0xa   :  { %181 = dma.done.wait [#allocation5], 512  }
   0xb   :  { %182 = vsyncadd [#allocation5], 4294966784  ;;  %v53_v0 = vld [vmem:[#allocation4 + $0x18] sm:$0xff]  ;;  %v52_v1 = vld [vmem:[#allocation4 + $0x10] sm:$0xff]  ;;  %vm58_vm0 = vcmask 261120  }
   0xc   :  { %115 = vmatpush.msra.mxu2 %v53_v0  ;;  %116 = vmatpush.msra.mxu3 %v53_v0  ;;  %v51_v2 = vld [vmem:[#allocation4 + $0x8] sm:$0xff]  ;;  %v50_v3 = vld [vmem:[#allocation4] sm:$0xff]  ;;  %v48_v4 = vld [vmem:[#allocation2 + $0x10] sm:$0xff] }
   0xd   :  { %83 = vmatpush.msra.mxu0 %v53_v0  ;;  %114 = vmatpush.msra.mxu1 %v53_v0  ;;  %v49_v5 = vld [vmem:[#allocation2 + $0x18] sm:$0xff]  ;;  %v46_v6 = vld [vmem:[#allocation2] sm:$0xff]  ;;  %v47_v7 = vld [vmem:[#allocation2 + $0x8] sm:$0xff] }
   0xe   :  { %118 = vmatpush.msra.mxu2 %v52_v1  ;;  %119 = vmatpush.msra.mxu3 %v52_v1  ;;  %v130_v8 = vld [vmem:[%s238_s2] ss:$0 sm:$0xff] }
   0xf   :  { %84 = vmatpush.msra.mxu0 %v52_v1  ;;  %117 = vmatpush.msra.mxu1 %v52_v1 }
  0x10   :  { %121 = vmatpush.msra.mxu2 %v51_v2  ;;  %122 = vmatpush.msra.mxu3 %v51_v2 }
  0x11   :  { %85 = vmatpush.msra.mxu0 %v51_v2  ;;  %120 = vmatpush.msra.mxu1 %v51_v2 }
  0x12   :  { %124 = vmatpush.msra.mxu2 %v50_v3  ;;  %125 = vmatpush.msra.mxu3 %v50_v3 }
  0x13   :  { %112 = vmatmul.msk.f32.vlgmr.msra.gmra.mxu2 %vm58_vm0, %v48_v4  ;;  %113 = vmatmul.msk.f32.vlgmr.msra.gmra.mxu3 %vm58_vm0, %v49_v5 }
  0x14   :  { %86 = vmatpush.msra.mxu0 %v50_v3  ;;  %123 = vmatpush.msra.mxu1 %v50_v3 }
  0x15   :  { %110 = vmatmul.msk.f32.vlgmr.msra.gmra.mxu0 %vm58_vm0, %v46_v6  ;;  %111 = vmatmul.msk.f32.vlgmr.msra.gmra.mxu1 %vm58_vm0, %v47_v7 }
  0x92   :  { %v88_v9 = vpop.f32.mrf.mxu0  ;;  %v91_v10 = vpop.f32.mrf.mxu1 }
  0x93   :  { %v89_v11 = vadd.f32 %v130_v8, %v88_v9  ;;  %v92_v12 = vadd.f32 %v130_v8, %v91_v10 }
  0x95   :  { %100 = vst.msk [vmem:[%s239_s3] sm:$0xff] %vm58_vm0, %v89_v11 }
  0x96   :  { %101 = vst.msk [vmem:[%s239_s3 + $0x8] sm:$0xff] %vm58_vm0, %v92_v12  ;;  %v94_v13 = vpop.f32.mrf.mxu2  ;;  %v97_v14 = vpop.f32.mrf.mxu3 }
  0x97   :  { %v95_v15 = vadd.f32 %v130_v8, %v94_v13  ;;  %v98_v16 = vadd.f32 %v130_v8, %v97_v14 }
  0x99   :  { %102 = vst.msk [vmem:[%s239_s3 + $0x10] sm:$0xff] %vm58_vm0, %v95_v15 }
  0x9a   :  { %103 = vst.msk [vmem:[%s239_s3 + $0x18] sm:$0xff] %vm58_vm0, %v98_v16 }
  0x9b   :  { %108 = vsyncpa [#allocation3], 1 }
  0x9c   :  { %109 = vsyncpa [#allocation5], 1 }

// kernel: cross_attention.9
= control target key start
LH: loop header
LB: loop body
LE: loop exit
PB: predicated region body
PF: predicated region fallthrough
CT: control target
= control target key end

     0   :  { %s198_s0 = inlined_call_operand.vmem [shape: f32[32,32], index: 0, kind: input, shape index: {}]   ;;  %s199_s1 = inlined_call_operand.vmem [shape: f32[32,32], index: 1, kind: input, shape index: {}]   ;;  %s200_s2 = inlined_call_operand.vmem [shape: f32[1,32], index: 2, kind: input, shape index: {}]   ;;  %s201_s3 = inlined_call_operand.hbm [shape: f32[32,32], index: 3, kind: output, shape index: {}]  }
   0x1   :  { %v22_v0 = vld [vmem:[%s199_s1 + $0x18] sm:$0xff]  ;;  %v21_v1 = vld [vmem:[%s199_s1 + $0x10] sm:$0xff]  ;;  %v20_v2 = vld [vmem:[%s199_s1 + $0x8] sm:$0xff] }
   0x2   :  { %96 = vmatpush.msra.mxu2 %v22_v0  ;;  %97 = vmatpush.msra.mxu3 %v22_v0 }
   0x3   :  { %52 = vmatpush.msra.mxu0 %v22_v0  ;;  %95 = vmatpush.msra.mxu1 %v22_v0 }
   0x4   :  { %99 = vmatpush.msra.mxu2 %v21_v1  ;;  %100 = vmatpush.msra.mxu3 %v21_v1 }
   0x5   :  { %8 = vsyncpa [#allocation3], 0  ;;  %v19_v3 = vld [vmem:[%s199_s1] sm:$0xff]  ;;  %53 = vmatpush.msra.mxu0 %v21_v1  ;;  %98 = vmatpush.msra.mxu1 %v21_v1  ;;  %v17_v4 = vld [vmem:[%s198_s0 + $0x10] sm:$0xff]  ;;  %vm27_vm0 = vcmask 261120   ;;  %s137_s29 = smov [#allocation2]  }
   0x6   :  { %102 = vmatpush.msra.mxu2 %v20_v2  ;;  %103 = vmatpush.msra.mxu3 %v20_v2  ;;  %v18_v5 = vld [vmem:[%s198_s0 + $0x18] sm:$0xff]  ;;  %v15_v6 = vld [vmem:[%s198_s0] sm:$0xff]  ;;  %v16_v7 = vld [vmem:[%s198_s0 + $0x8] sm:$0xff]  ;;  %s77_s0 = sshll.u32 %s137_s29, 4  ;;  %s79_s5 = sshll.u32 %s201_s3, 4  ;;  %s78_s0 = int_to_ptr.vmem [resolvable:$true] %s77_s0  ;;  %s80_s5 = int_to_ptr.hbm [resolvable:$true] %s79_s5 }
   0x7   :  { %54 = vmatpush.msra.mxu0 %v20_v2  ;;  %101 = vmatpush.msra.mxu1 %v20_v2  ;;  %v110_v8 = vld [vmem:[%s200_s2] ss:$0 sm:$0xff]  ;;  %s138_s2 = smov 128   ;;  %s139_s6 = smov 8  }
   0x8   :  { %105 = vmatpush.msra.mxu2 %v19_v3  ;;  %106 = vmatpush.msra.mxu3 %v19_v3 }
   0x9   :  { %93 = vmatmul.msk.f32.vlgmr.msra.gmra.mxu2 %vm27_vm0, %v17_v4  ;;  %94 = vmatmul.msk.f32.vlgmr.msra.gmra.mxu3 %vm27_vm0, %v18_v5 }
   0xa   :  { %55 = vmatpush.msra.mxu0 %v19_v3  ;;  %104 = vmatpush.msra.mxu1 %v19_v3 }
   0xb   :  { %91 = vmatmul.msk.f32.vlgmr.msra.gmra.mxu0 %vm27_vm0, %v15_v6  ;;  %92 = vmatmul.msk.f32.vlgmr.msra.gmra.mxu1 %vm27_vm0, %v16_v7 }
  0x88   :  { %v57_v9 = vpop.f32.mrf.mxu0  ;;  %v60_v10 = vpop.f32.mrf.mxu1 }
  0x89   :  { %v58_v11 = vadd.f32 %v110_v8, %v57_v9  ;;  %v61_v12 = vadd.f32 %v110_v8, %v60_v10 }
  0x8b   :  { %69 = vst.msk [vmem:[#allocation2] sm:$0xff] %vm27_vm0, %v58_v11 }
  0x8c   :  { %70 = vst.msk [vmem:[#allocation2 + $0x8] sm:$0xff] %vm27_vm0, %v61_v12  ;;  %v63_v13 = vpop.f32.mrf.mxu2  ;;  %v66_v14 = vpop.f32.mrf.mxu3 }
  0x8d   :  { %v64_v15 = vadd.f32 %v110_v8, %v63_v13  ;;  %v67_v16 = vadd.f32 %v110_v8, %v66_v14 }
  0x8f   :  { %71 = vst.msk [vmem:[#allocation2 + $0x10] sm:$0xff] %vm27_vm0, %v64_v15 }
  0x90   :  { %72 = vst.msk [vmem:[#allocation2 + $0x18] sm:$0xff] %vm27_vm0, %v67_v16 }
  0x91   :  { %85 = dma.vmem_to_hbm [thread:$0]  %s78_s0, 512, %s80_s5, [#allocation3], %s138_s2, %s138_s2, %s139_s6  }
  0x92   :  { %135 = dma.done.wait [#allocation3], 512  }
  0x93   :  { %136 = vsyncadd [#allocation3], 4294966784 }
  0x94   :  { %90 = vsyncpa [#allocation3], 1 }

// kernel: cross_attention.8
= control target key start
LH: loop header
LB: loop body
LE: loop exit
PB: predicated region body
PF: predicated region fallthrough
CT: control target
= control target key end

     0   :  { %s866_s12 = smov 0   ;;  %s1051_s0 = inlined_call_operand.vmem [shape: f32[2,4,16,8], index: 0, kind: input, shape index: {}]   ;;  %s1052_s1 = inlined_call_operand.vmem [shape: f32[2,4,8,8], index: 1, kind: input, shape index: {}]   ;;  %s1053_s2 = inlined_call_operand.vmem [shape: f32[2,4,8,8], index: 2, kind: input, shape index: {}]   ;;  %s1054_s3 = inlined_call_operand.vmem [shape: f32[2,4,16,8], index: 3, kind: output, shape index: {}]  }
   0x1 LB: > { %s759_s13 = sadd.s32 4294967295, %s844_s12   ;;  %p763_p0 = scmp.ge.s32.totalorder %s844_s12, 1  ;;  %s844_s12 = sphi %s866_s12, %s13_s12  }
   0x2   : > { %p157_p1 = scmp.lt.s32.totalorder %s844_s12, 3 }
   0x4   : > { %p158_p2 = pnand %p763_p0, %p157_p1 }
   0x5   : > { %p191_p3 = scmp.lt.s32.totalorder (!%p158_p2), %s759_s13, 1 }
   0x6   : > { %161 = sbr.rel (%p158_p2) target bundleno = 569 (0x239), region = 32 }
   0xb   : > { %s1066_s13 = smov (!%p191_p3, %s759_s13), 1  ;;  %vm227_vm0 = vcmask 64512  }
   0xc   : > { %s794_s14 = sshll.u32 %s1066_s13, 6  ;;  %s795_s15 = sshll.u32 %s1066_s13, 5 }
   0xd   : > { %s195_s18 = scalar_lea.vmem %s1051_s0, %s794_s14  ;;  %s200_s21 = scalar_lea.vmem %s1052_s1, %s795_s15 }
   0xe   : > { %v219_v0 = vld [vmem:[%s200_s21] sm:$0xff]  ;;  %v221_v1 = vld [vmem:[%s200_s21 + $0x10] sm:$0xff]  ;;  %v220_v4 = vld [vmem:[%s200_s21 + $0x8] sm:$0xff]  ;;  %s205_s24 = scalar_lea.vmem %s1053_s2, %s795_s15  ;;  %s210_s27 = scalar_lea.vmem %s1054_s3, %s794_s14 }
   0xf   : > { %v211_v2 = vld [vmem:[%s195_s18] sm:$0xff]  ;;  %772 = vmatpush.xpose.msk.msra.mxu0 %vm227_vm0, %v219_v0  ;;  %778 = vmatpush.xpose.msk.msra.mxu2 %vm227_vm0, %v221_v1  ;;  %v222_v5 = vld [vmem:[%s200_s21 + $0x18] sm:$0xff]  ;;  %v213_v6 = vld [vmem:[%s195_s18 + $0x10] sm:$0xff] }
  0x10   : > { %v215_v3 = vld [vmem:[%s195_s18 + $0x20] sm:$0xff]  ;;  %775 = vmatpush.xpose.msk.msra.mxu1 %vm227_vm0, %v220_v4  ;;  %781 = vmatpush.xpose.msk.msra.mxu3 %vm227_vm0, %v222_v5  ;;  %v217_v7 = vld [vmem:[%s195_s18 + $0x30] sm:$0xff]  ;;  %v216_v8 = vld [vmem:[%s195_s18 + $0x28] sm:$0xff] }
  0x11   : > { %v212_v9 = vld [vmem:[%s195_s18 + $0x8] sm:$0xff]  ;;  %v214_v10 = vld [vmem:[%s195_s18 + $0x18] sm:$0xff] }
  0x12   : > { %773 = vmatmul.msk.f32.vlgmr.msra.gmra.mxu0 %vm227_vm0, %v211_v2  ;;  %779 = vmatmul.msk.f32.vlgmr.msra.gmra.mxu2 %vm227_vm0, %v215_v3  ;;  %v218_v11 = vld [vmem:[%s195_s18 + $0x38] sm:$0xff] }
  0x13   : > { %776 = vmatmul.msk.f32.vlgmr.msra.gmra.mxu1 %vm227_vm0, %v213_v6  ;;  %782 = vmatmul.msk.f32.vlgmr.msra.gmra.mxu3 %vm227_vm0, %v217_v7 }
  0x1a   : > { %780 = vmatmul.msk.f32.gmra.mxu2 %vm227_vm0, %v216_v8  ;;  %774 = vmatmul.msk.f32.gmra.mxu0 %vm227_vm0, %v212_v9 }
  0x1b   : > { %777 = vmatmul.msk.f32.gmra.mxu1 %vm227_vm0, %v214_v10  ;;  %783 = vmatmul.msk.f32.gmra.mxu3 %vm227_vm0, %v218_v11 }
  0x8f   : > { %v254_v12 = vpop.f32.mrf.mxu0 }
  0x90   : > { %v356_v13 = vmul.f32 0.35355338, %v254_v12  ;;  %v286_v14 = vpop.f32.mrf.mxu1  ;;  %v223_v12 = vld [vmem:[%s205_s24] sm:$0xff] }
  0x91   : > { %v358_v16 = vmul.f32 0.35355338, %v286_v14  ;;  %577 = vmatpush.msrb.mxu0 %v223_v12  ;;  %v226_v14 = vld [vmem:[%s205_s24 + $0x18] sm:$0xff] }
  0x92   : > { %v364_v15 = vsel %vm227_vm0, %v356_v13, -inf  ;;  %664 = vmatpush.msrb.mxu3 %v226_v14 }
  0x93   : > { %365 = vmax.xlane.f32.xlu1 %v364_v15  ;;  %v370_v21 = vsel %vm227_vm0, %v358_v16, -inf }
  0x95   : > { %v318_v17 = vpop.f32.mrf.mxu2 }
  0x96   : > { %v360_v18 = vmul.f32 0.35355338, %v318_v17  ;;  %v350_v19 = vpop.f32.mrf.mxu3 }
  0x97   : > { %v362_v23 = vmul.f32 0.35355338, %v350_v19  ;;  %v257_v28 = vpop.f32.mrf.mxu0 }
  0x98   : > { %v376_v20 = vsel %vm227_vm0, %v360_v18, -inf  ;;  %v289_v22 = vpop.f32.mrf.mxu1  ;;  %v357_v32 = vmul.f32 0.35355338, %v257_v28 }
  0x99   : > { %377 = vmax.xlane.f32.xlu0 %v376_v20  ;;  %v359_v24 = vmul.f32 0.35355338, %v289_v22  ;;  %v382_v27 = vsel %vm227_vm0, %v362_v23, -inf }
  0x9a   : > { %v367_v35 = vsel %vm227_vm0, %v357_v32, -inf }
  0x9b   : > { %371 = vmax.xlane.f32.xlu1 %v370_v21  ;;  %v373_v31 = vsel %vm227_vm0, %v359_v24, -inf }
  0x9d   : > { %v321_v25 = vpop.f32.mrf.mxu2 }
  0x9e   : > { %v361_v26 = vmul.f32 0.35355338, %v321_v25  ;;  %v353_v29 = vpop.f32.mrf.mxu3 }
  0x9f   : > { %v363_v33 = vmul.f32 0.35355338, %v353_v29 }
  0xa0   : > { %v379_v30 = vsel %vm227_vm0, %v361_v26, -inf }
  0xa1   : > { %383 = vmax.xlane.f32.xlu0 %v382_v27  ;;  %380 = vmax.xlane.f32.xlu2 %v379_v30  ;;  %v385_v34 = vsel %vm227_vm0, %v363_v33, -inf }
  0xa3   : > { %374 = vmax.xlane.f32.xlu1 %v373_v31 }
  0xa9   : > { %386 = vmax.xlane.f32.xlu2 %v385_v34  ;;  %368 = vmax.xlane.f32.xlu0 %v367_v35 }
 0x106   : > { %v366_v36 = vpop.xlane.xlu1 %365 }
 0x107   : > { %v388_v37 = vsub.f32 %v356_v13, %v366_v36  ;;  %v225_v13 = vld [vmem:[%s205_s24 + $0x10] sm:$0xff] }
 0x108   : > { %635 = vmatpush.msrb.mxu2 %v225_v13 }
 0x109   : > { %v396_v38 = vmul.f32 1.442695, %v388_v37 }
 0x10b   : > { %806 = vpow2.f32 %v396_v38 }
 0x10c   : > { %v378_v39 = vpop.xlane.xlu0 %377 }
 0x10d   : > { %v392_v40 = vsub.f32 %v360_v18, %v378_v39 }
 0x10e   : > { %v372_v41 = vpop.xlane.xlu1 %371 }
 0x10f   : > { %v404_v42 = vmul.f32 1.442695, %v392_v40  ;;  %v390_v43 = vsub.f32 %v358_v16, %v372_v41  ;;  %v224_v16 = vld [vmem:[%s205_s24 + $0x8] sm:$0xff] }
 0x110   : > { %606 = vmatpush.msrb.mxu1 %v224_v16 }
 0x111   : > { %v908_v44 = vpop.eup %806  ;;  %808 = vpow2.f32 %v404_v42  ;;  %v400_v46 = vmul.f32 1.442695, %v390_v43 }
 0x112   : > { %v412_v45 = vsel %vm227_vm0, %v908_v44, 0.0 }
 0x113   : > { %413 = vadd.xlane.f32.xlu1 %v412_v45  ;;  %810 = vpow2.f32 %v400_v46 }
 0x114   : > { %v384_v47 = vpop.xlane.xlu0 %383  ;;  %v381_v48 = vpop.xlane.xlu2 %380 }
 0x115   : > { %v394_v49 = vsub.f32 %v362_v23, %v384_v47  ;;  %v393_v52 = vsub.f32 %v361_v26, %v381_v48 }
 0x116   : > { %v375_v55 = vpop.xlane.xlu1 %374 }
 0x117   : > { %v912_v50 = vpop.eup %808  ;;  %v408_v51 = vmul.f32 1.442695, %v394_v49  ;;  %v406_v54 = vmul.f32 1.442695, %v393_v52  ;;  %v391_v62 = vsub.f32 %v359_v24, %v375_v55 }
 0x118   : > { %v424_v53 = vsel %vm227_vm0, %v912_v50, 0.0 }
 0x119   : > { %812 = vpow2.f32 %v408_v51  ;;  %425 = vadd.xlane.f32.xlu2 %v424_v53  ;;  %v916_v58 = vpop.eup %810  ;;  %v402_v3 = vmul.f32 1.442695, %v391_v62 }
 0x11a   : > { %814 = vpow2.f32 %v406_v54  ;;  %v418_v1 = vsel %vm227_vm0, %v916_v58, 0.0 }
 0x11c   : > { %v387_v56 = vpop.xlane.xlu2 %386  ;;  %v369_v57 = vpop.xlane.xlu0 %368 }
 0x11d   : > { %v395_v59 = vsub.f32 %v363_v33, %v387_v56  ;;  %v389_v60 = vsub.f32 %v357_v32, %v369_v57 }
 0x11f   : > { %v918_v61 = vpop.eup %812  ;;  %v410_v63 = vmul.f32 1.442695, %v395_v59  ;;  %v398_v0 = vmul.f32 1.442695, %v389_v60 }
 0x120   : > { %v430_v2 = vsel %vm227_vm0, %v918_v61, 0.0  ;;  %v924_v4 = vpop.eup %814 }
 0x121   : > { %816 = vpow2.f32 %v410_v63  ;;  %419 = vadd.xlane.f32.xlu2 %v418_v1  ;;  %431 = vadd.xlane.f32.xlu0 %v430_v2  ;;  %v427_v8 = vsel %vm227_vm0, %v924_v4, 0.0 }
 0x122   : > { %818 = vpow2.f32 %v398_v0 }
 0x123   : > { %820 = vpow2.f32 %v402_v3 }
 0x127   : > { %v926_v5 = vpop.eup %816 }
 0x128   : > { %v928_v6 = vpop.eup %818  ;;  %v433_v7 = vsel %vm227_vm0, %v926_v5, 0.0 }
 0x129   : > { %434 = vadd.xlane.f32.xlu1 %v433_v7  ;;  %428 = vadd.xlane.f32.xlu0 %v427_v8  ;;  %v415_v9 = vsel %vm227_vm0, %v928_v6, 0.0  ;;  %v936_v10 = vpop.eup %820 }
 0x12a   : > { %416 = vadd.xlane.f32.xlu2 %v415_v9  ;;  %v421_v11 = vsel %vm227_vm0, %v936_v10, 0.0 }
 0x131   : > { %422 = vadd.xlane.f32.xlu0 %v421_v11 }
 0x186   : > { %v414_v15 = vpop.xlane.xlu1 %413 }
 0x187   : > { %822 = vrcp.f32 %v414_v15  ;;  %v447_v22 = vand.u32 2147483648, %v414_v15  ;;  %v445_v24 = vand.u32 2147483647, %v414_v15  ;;  %vm441_vm2 = vweird.f32 %v414_v15 }
 0x189   : > { %v448_v29 = vor.u32 1.1754944e-38, %v447_v22  ;;  %vm446_vm4 = vcmp.eq.f32.partialorder %v445_v24, 8.507059e+37 }
 0x18c   : > { %v426_v17 = vpop.xlane.xlu2 %425 }
 0x18d   : > { %v823_v18 = vpop.eup %822  ;;  %824 = vrcp.f32 %v426_v17  ;;  %v507_v37 = vand.u32 2147483648, %v426_v17  ;;  %vm501_vm6 = vweird.f32 %v426_v17  ;;  %v505_v42 = vand.u32 2147483647, %v426_v17 }
 0x18e   : > { %v437_v19 = vmul.f32 %v823_v18, %v414_v15  ;;  %vm442_vm1 = vweird.f32 %v823_v18 }
 0x18f   : > { %vm443_vm3 = vmor %vm441_vm2, %vm442_vm1  ;;  %v508_v49 = vor.u32 1.1754944e-38, %v507_v37  ;;  %vm506_vm9 = vcmp.eq.f32.partialorder %v505_v42, 8.507059e+37 }
 0x190   : > { %v438_v20 = vsub.f32 1.0, %v437_v19 }
 0x192   : > { %v439_v21 = vmul.f32 %v823_v18, %v438_v20 }
 0x193   : > { %v825_v23 = vpop.eup %824 }
 0x194   : > { %v440_v25 = vadd.f32 %v823_v18, %v439_v21  ;;  %v497_v26 = vmul.f32 %v825_v23, %v426_v17  ;;  %v420_v27 = vpop.xlane.xlu2 %419  ;;  %v945_v28 = vpop.xlane.xlu0 %431  ;;  %vm502_vm5 = vweird.f32 %v825_v23 }
 0x195   : > { %826 = vrcp.f32 %v420_v27  ;;  %vm958_vm7 = vmor %vm501_vm6, %vm502_vm5  ;;  %v475_v47 = vand.u32 2147483647, %v420_v27  ;;  %v477_v48 = vand.u32 2147483648, %v420_v27  ;;  %v535_v52 = vand.u32 2147483647, %v945_v28 }
 0x196   : > { %v498_v30 = vsub.f32 1.0, %v497_v26  ;;  %828 = vrcp.f32 %v945_v28  ;;  %v444_v31 = vsel %vm443_vm3, %v823_v18, %v440_v25  ;;  %v537_v55 = vand.u32 2147483648, %v945_v28 }
 0x197   : > { %v449_v33 = vsel %vm446_vm4, %v448_v29, %v444_v31  ;;  %vm471_vm10 = vweird.f32 %v420_v27  ;;  %vm531_vm11 = vweird.f32 %v945_v28  ;;  %vm969_vm12 = vcmp.eq.f32.partialorder %v475_v47, 8.507059e+37 }
 0x198   : > { %v499_v32 = vmul.f32 %v825_v23, %v498_v30  ;;  %v450_v34 = vmul.f32 %v908_v44, %v449_v33  ;;  %v478_v60 = vor.u32 1.1754944e-38, %v477_v48  ;;  %vm977_vm15 = vcmp.eq.f32.partialorder %v535_v52, 8.507059e+37 }
 0x199   : > { %v538_v8 = vor.u32 1.1754944e-38, %v537_v55 }
 0x19a   : > { %v500_v36 = vadd.f32 %v825_v23, %v499_v32  ;;  %784 = vmatmul.msk.f32.vlgmr.msrb.gmra.mxu0 %vm227_vm0, %v450_v34 }
 0x19b   : > { %v827_v35 = vpop.eup %826 }
 0x19c   : > { %v829_v38 = vpop.eup %828  ;;  %v467_v39 = vmul.f32 %v827_v35, %v420_v27  ;;  %v950_v40 = vpop.xlane.xlu1 %434  ;;  %v504_v53 = vsel %vm958_vm7, %v825_v23, %v500_v36  ;;  %vm472_vm8 = vweird.f32 %v827_v35 }
 0x19d   : > { %v952_v41 = vpop.xlane.xlu0 %428  ;;  %v527_v43 = vmul.f32 %v829_v38, %v945_v28  ;;  %830 = vrcp.f32 %v950_v40  ;;  %v956_v45 = vpop.xlane.xlu2 %416  ;;  %v509_v62 = vsel %vm506_vm9, %v508_v49, %v504_v53  ;;  %vm973_vm13 = vmor %vm471_vm10, %vm472_vm8  ;;  %vm532_vm14 = vweird.f32 %v829_v38 }
 0x19e   : > { %v468_v46 = vsub.f32 1.0, %v467_v39  ;;  %832 = vrcp.f32 %v956_v45  ;;  %v510_v3 = vmul.f32 %v912_v50, %v509_v62  ;;  %vm546_vm1 = vweird.f32 %v950_v40  ;;  %vm533_vm2 = vmor %vm531_vm11, %vm532_vm14 }
 0x19f   : > { %v528_v51 = vsub.f32 1.0, %v527_v43  ;;  %834 = vrcp.f32 %v952_v41  ;;  %v550_v13 = vand.u32 2147483647, %v950_v40  ;;  %v552_v14 = vand.u32 2147483648, %v950_v40 }
 0x1a0   : > { %v469_v54 = vmul.f32 %v827_v35, %v468_v46  ;;  %788 = vmatmul.msk.f32.vlgmr.msrb.gmra.mxu2 %vm227_vm0, %v510_v3  ;;  %vm456_vm3 = vweird.f32 %v956_v45  ;;  %v460_v17 = vand.u32 2147483647, %v956_v45  ;;  %v462_v24 = vand.u32 2147483648, %v956_v45 }
 0x1a1   : > { %v529_v56 = vmul.f32 %v829_v38, %v528_v51  ;;  %vm1007_vm6 = vcmp.eq.f32.partialorder %v550_v13, 8.507059e+37  ;;  %v522_v31 = vand.u32 2147483648, %v952_v41  ;;  %vm516_vm11 = vweird.f32 %v952_v41 }
 0x1a2   : > { %v470_v57 = vadd.f32 %v827_v35, %v469_v54  ;;  %vm461_vm10 = vcmp.eq.f32.partialorder %v460_v17, 8.507059e+37 }
 0x1a3   : > { %v831_v63 = vpop.eup %830  ;;  %v530_v1 = vadd.f32 %v829_v38, %v529_v56  ;;  %v523_v42 = vor.u32 1.1754944e-38, %v522_v31 }
 0x1a4   : > { %v833_v7 = vpop.eup %832  ;;  %v542_v9 = vmul.f32 %v831_v63, %v950_v40  ;;  %v474_v12 = vsel %vm973_vm13, %v827_v35, %v470_v57  ;;  %vm547_vm4 = vweird.f32 %v831_v63  ;;  %v520_v35 = vand.u32 2147483647, %v952_v41 }
 0x1a5   : > { %v984_v11 = vpop.xlane.xlu0 %422  ;;  %v452_v15 = vmul.f32 %v833_v7, %v956_v45  ;;  %v835_v50 = vpop.eup %834  ;;  %v479_v18 = vsel %vm969_vm12, %v478_v60, %v474_v12  ;;  %v534_v22 = vsel %vm533_vm2, %v829_v38, %v530_v1  ;;  %vm457_vm5 = vweird.f32 %v833_v7  ;;  %vm548_vm7 = vmor %vm546_vm1, %vm547_vm4 }
 0x1a6   : > { %836 = vrcp.f32 %v984_v11  ;;  %v543_v16 = vsub.f32 1.0, %v542_v9  ;;  %v512_v20 = vmul.f32 %v835_v50, %v952_v41  ;;  %v480_v21 = vmul.f32 %v916_v58, %v479_v18  ;;  %vm458_vm9 = vmor %vm456_vm3, %vm457_vm5 }
 0x1a7   : > { %v453_v19 = vsub.f32 1.0, %v452_v15  ;;  %v539_v25 = vsel %vm977_vm15, %v538_v8, %v534_v22  ;;  %v553_v58 = vor.u32 1.1754944e-38, %v552_v14  ;;  %vm517_vm8 = vweird.f32 %v835_v50 }
 0x1a8   : > { %v544_v23 = vmul.f32 %v831_v63, %v543_v16  ;;  %v513_v27 = vsub.f32 1.0, %v512_v20  ;;  %786 = vmatmul.msk.f32.vlgmr.msrb.gmra.mxu1 %vm227_vm0, %v480_v21  ;;  %v540_v28 = vmul.f32 %v918_v61, %v539_v25  ;;  %v463_v61 = vor.u32 1.1754944e-38, %v462_v24  ;;  %vm518_vm12 = vmor %vm516_vm11, %vm517_vm8 }
 0x1a9   : > { %v454_v26 = vmul.f32 %v833_v7, %v453_v19  ;;  %v492_v44 = vand.u32 2147483648, %v984_v11  ;;  %vm521_vm13 = vcmp.eq.f32.partialorder %v520_v35, 8.507059e+37  ;;  %v490_v41 = vand.u32 2147483647, %v984_v11 }
 0x1aa   : > { %v545_v29 = vadd.f32 %v831_v63, %v544_v23  ;;  %v514_v34 = vmul.f32 %v835_v50, %v513_v27  ;;  %790 = vmatmul.msk.f32.vlgmr.msrb.gmra.mxu3 %vm227_vm0, %v540_v28  ;;  %vm486_vm15 = vweird.f32 %v984_v11 }
 0x1ab   : > { %v455_v33 = vadd.f32 %v833_v7, %v454_v26  ;;  %v493_v54 = vor.u32 1.1754944e-38, %v492_v44  ;;  %vm491_vm2 = vcmp.eq.f32.partialorder %v490_v41, 8.507059e+37 }
 0x1ac   : > { %v837_v32 = vpop.eup %836  ;;  %v549_v37 = vsel %vm548_vm7, %v831_v63, %v545_v29  ;;  %v515_v39 = vadd.f32 %v835_v50, %v514_v34 }
 0x1ad   : > { %v482_v36 = vmul.f32 %v837_v32, %v984_v11  ;;  %v459_v38 = vsel %vm458_vm9, %v833_v7, %v455_v33  ;;  %v554_v40 = vsel %vm1007_vm6, %v553_v58, %v549_v37  ;;  %vm487_vm14 = vweird.f32 %v837_v32 }
 0x1ae   : > { %v464_v46 = vsel %vm461_vm10, %v463_v61, %v459_v38  ;;  %v519_v47 = vsel %vm518_vm12, %v835_v50, %v515_v39  ;;  %v555_v48 = vmul.f32 %v926_v5, %v554_v40  ;;  %vm488_vm1 = vmor %vm486_vm15, %vm487_vm14 }
 0x1af   : > { %v483_v43 = vsub.f32 1.0, %v482_v36  ;;  %v465_v45 = vmul.f32 %v928_v6, %v464_v46  ;;  %v524_v51 = vsel %vm521_vm13, %v523_v42, %v519_v47 }
 0x1b0   : > { %v525_v52 = vmul.f32 %v924_v4, %v524_v51 }
 0x1b1   : > { %v484_v49 = vmul.f32 %v837_v32, %v483_v43  ;;  %785 = vmatmul.msk.f32.gmra.mxu0 %vm227_vm0, %v465_v45 }
 0x1b2   : > { %789 = vmatmul.msk.f32.gmra.mxu2 %vm227_vm0, %v525_v52  ;;  %791 = vmatmul.msk.f32.gmra.mxu3 %vm227_vm0, %v555_v48 }
 0x1b3   : > { %v485_v53 = vadd.f32 %v837_v32, %v484_v49 }
 0x1b5   : > { %v489_v5 = vsel %vm488_vm1, %v837_v32, %v485_v53 }
 0x1b6   : > { %v494_v6 = vsel %vm491_vm2, %v493_v54, %v489_v5 }
 0x1b7   : > { %v495_v55 = vmul.f32 %v936_v10, %v494_v6 }
 0x1b9   : > { %787 = vmatmul.msk.f32.gmra.mxu1 %vm227_vm0, %v495_v55 }
 0x217   : > { %v579_v4 = vpop.f32.mrf.mxu0 }
 0x218   : > { %672 = vst.msk [vmem:[%s210_s27] sm:$0xff] %vm227_vm0, %v579_v4 }
 0x223   : > { %v637_v57 = vpop.f32.mrf.mxu2 }
 0x224   : > { %676 = vst.msk [vmem:[%s210_s27 + $0x20] sm:$0xff] %vm227_vm0, %v637_v57 }
 0x225   : > { %v608_v56 = vpop.f32.mrf.mxu1 }
 0x226   : > { %674 = vst.msk [vmem:[%s210_s27 + $0x10] sm:$0xff] %vm227_vm0, %v608_v56 }
 0x22d   : > { %v666_v59 = vpop.f32.mrf.mxu3 }
 0x22e   : > { %v582_v60 = vpop.f32.mrf.mxu0  ;;  %678 = vst.msk [vmem:[%s210_s27 + $0x30] sm:$0xff] %vm227_vm0, %v666_v59 }
 0x22f   : > { %673 = vst.msk [vmem:[%s210_s27 + $0x8] sm:$0xff] %vm227_vm0, %v582_v60 }
 0x235   : > { %v640_v62 = vpop.f32.mrf.mxu2  ;;  %v669_v63 = vpop.f32.mrf.mxu3 }
 0x236   : > { %v611_v10 = vpop.f32.mrf.mxu1  ;;  %677 = vst.msk [vmem:[%s210_s27 + $0x28] sm:$0xff] %vm227_vm0, %v640_v62 }
 0x237   : > { %675 = vst.msk [vmem:[%s210_s27 + $0x18] sm:$0xff] %vm227_vm0, %v611_v10 }
 0x238   : > { %679 = vst.msk [vmem:[%s210_s27 + $0x38] sm:$0xff] %vm227_vm0, %v669_v63 }
 0x239 PF: > { %s13_s12 = sadd.s32 1, %s844_s12  }
 0x23a   : > { %p10_p4 = scmp.ge.s32.totalorder %s13_s12, 4  }
 0x23c   :  { %12 = sbr.rel (!%p10_p4) target bundleno = 1 (0x1), region = 68 }

</bundles_post_ra>
